<compile_context>
chip_gen: v7x
topology: tpu7x:2x2x1
jax: 0.10.0
libtpu: 0.0.40
codegen_flags: <defaults>
</compile_context>

<pallas_src>
import jax
import jax.numpy as jnp
from jax.experimental import pallas as pl
from jax.experimental.pallas import tpu as pltpu

DROP_P = 0.39999995
KEEP_SCALE = 1.0 / (1.0 - DROP_P)
# drop element iff hash_bits < threshold  (P ~= DROP_P); floor, not round.
DROP_THRESHOLD_U32 = int(DROP_P * (2 ** 32))


def _fmix32(h):
    h = h ^ (h >> 16)
    h = h * jnp.uint32(0x85EBCA6B)
    h = h ^ (h >> 13)
    h = h * jnp.uint32(0xC2B2AE35)
    h = h ^ (h >> 16)
    return h


def _dropout_keep_mask(seed_u32, shape):
    """Portable counter-based PRNG: fmix32 rounds over (seed, row, col).

    Row and col are mixed in separate full fmix rounds so distinct (row, col)
    pairs cannot alias via an additive pre-mix.  Works identically inside the
    Pallas kernel (Mosaic) and in plain JAX, so the kernel can be validated
    against a pure-JAX reference.  Not bit-exact with PyTorch's bernoulli_,
    but has the right keep rate.
    """
    rows = jax.lax.broadcasted_iota(jnp.int32, shape, 0).astype(jnp.uint32)
    cols = jax.lax.broadcasted_iota(jnp.int32, shape, 1).astype(jnp.uint32)
    h = seed_u32 ^ jnp.uint32(0x9E3779B9)
    h = _fmix32(h ^ rows)
    h = _fmix32(h ^ cols)
    return h >= jnp.uint32(DROP_THRESHOLD_U32)


def attn_kernel(seed_ref, z_ref, w_ref, b_ref, o_ref):
    # Shared Linear over z = cat([x, y]) : one (B,6)@(6,8) matmul + bias.
    q = (jnp.dot(z_ref[...], w_ref[...], preferred_element_type=jnp.float32)
         + b_ref[...])                                         # (B, 8); q = k = v

    # qk/8 == (q * 1/8) @ k^T : fold the scale into the small (B, 8) operand.
    qs = q * jnp.float32(0.125)
    qk = pl.dot(qs, q, trans_b=True)                           # (B, B)

    # Numerically-stable softmax over the last dim.  The per-row reciprocal
    # goes to the EUP (approx) and carries the dropout 1/(1-p) scale, so no
    # extra multiply on the output tile is needed.
    m = jnp.max(qk, axis=-1, keepdims=True)
    e = jnp.exp(qk - m)
    inv = pl.reciprocal(jnp.sum(e, axis=-1, keepdims=True), approx=True)
    sm = e * (inv * jnp.float32(KEEP_SCALE))

    # Dropout keep-mask: integer hash + integer compare (no float RNG math).
    keep = _dropout_keep_mask(seed_ref[0].astype(jnp.uint32), sm.shape)
    dsm = jnp.where(keep, sm, jnp.float32(0.0))

    # output = dropout(softmax * keep_scale) @ v
    out = jnp.dot(dsm, q, preferred_element_type=jnp.float32)
    o_ref[...] = out.astype(o_ref.dtype)


def model_forward(x, y, w, b, seed):
    """x, y: (B, 3) f32; w: (8, 6) f32 (PyTorch layout); b: (8,) f32; seed: (1,) i32."""
    B = x.shape[0]
    H = w.shape[0]
    z = jnp.concatenate([x, y], axis=-1)   # (B, 6) — 48 bytes, XLA fuses it
    w_t = w.T                               # (6, 8) — one-time weight prep
    return pl.pallas_call(
        attn_kernel,
        out_shape=jax.ShapeDtypeStruct((B, H), jnp.float32),
        in_specs=[
            pl.BlockSpec(memory_space=pltpu.MemorySpace.SMEM),   # seed (scalar)
            pl.BlockSpec(memory_space=pltpu.MemorySpace.VMEM),   # z
            pl.BlockSpec(memory_space=pltpu.MemorySpace.VMEM),   # W^T
            pl.BlockSpec(memory_space=pltpu.MemorySpace.VMEM),   # bias
        ],
        out_specs=pl.BlockSpec(memory_space=pltpu.MemorySpace.VMEM),
    )(seed, z, w_t, b.reshape(1, -1))


def reference(x, y, w, b, seed):
    """Pure-JAX reference with the same (hash-based) dropout mask.

    Uses an exact reciprocal, so the kernel (approx EUP reciprocal) matches it
    to ~1e-3 relative, not bit-exactly.
    """
    z = jnp.concatenate([x, y], axis=-1)
    q = z @ w.T + b
    qk = (q * jnp.float32(0.125)) @ q.T
    m = jnp.max(qk, axis=-1, keepdims=True)
    e = jnp.exp(qk - m)
    sm = e * (1.0 / jnp.sum(e, axis=-1, keepdims=True))
    keep = _dropout_keep_mask(seed[0].astype(jnp.uint32), sm.shape)
    dsm = jnp.where(keep, sm, jnp.float32(0.0))
    return (dsm @ q) * jnp.float32(KEEP_SCALE)


if __name__ == "__main__":
    key = jax.random.PRNGKey(0)
    kx, ky, kw, kb = jax.random.split(key, 4)

    B = 2
    x = jax.random.normal(kx, (B, 3), dtype=jnp.float32)
    y = jax.random.normal(ky, (B, 3), dtype=jnp.float32)

    # PyTorch-style Linear init: U(-1/sqrt(fan_in), 1/sqrt(fan_in)), fan_in=6.
    fan_in = 6
    bound = 1.0 / (fan_in ** 0.5)
    w = jax.random.uniform(kw, (8, 6), minval=-bound, maxval=bound,
                           dtype=jnp.float32)   # PyTorch layout (out, in)
    b = jax.random.uniform(kb, (8,), minval=-bound, maxval=bound,
                           dtype=jnp.float32)

    seed = jnp.array([0], dtype=jnp.int32)

    out = model_forward(x, y, w, b, seed)
    jax.block_until_ready(out)

    assert out.shape == (B, 8)
    assert bool(jnp.all(jnp.isfinite(out)))
    ref = reference(x, y, w, b, seed)
    # approx EUP reciprocal in-kernel vs exact reciprocal in the reference.
    assert bool(jnp.allclose(out, ref, rtol=1e-2, atol=1e-3))
    print("KERNEL_OK")
</pallas_src>

<mosaic_0001>
module attributes {stable_mosaic.version = 11 : i64} {
  func.func @attn_kernel(%arg0: memref<1xi32, #tpu.memory_space<smem>>, %arg1: memref<2x6xf32, #tpu.memory_space<vmem>>, %arg2: memref<6x8xf32, #tpu.memory_space<vmem>>, %arg3: memref<1x8xf32, #tpu.memory_space<vmem>>, %arg4: memref<2x8xf32, #tpu.memory_space<vmem>>) attributes {dimension_semantics = [], scalar_prefetch = 0 : i64, scratch_operands = 0 : i64, tpu.core_type = #tpu.core_type<tc>} {
    %c0 = arith.constant 0 : index
    %c0_0 = arith.constant 0 : index
    %0 = vector.load %arg1[%c0, %c0_0] : memref<2x6xf32, #tpu.memory_space<vmem>>, vector<2x6xf32>
    %c0_1 = arith.constant 0 : index
    %c0_2 = arith.constant 0 : index
    %1 = vector.load %arg2[%c0_1, %c0_2] : memref<6x8xf32, #tpu.memory_space<vmem>>, vector<6x8xf32>
    %cst = arith.constant dense<0.000000e+00> : vector<2x8xf32>
    %2 = tpu.matmul %0, %1, %cst {dimension_numbers = #tpu.dot_dimension_numbers<[1], [0], [0], [1], [0, 0, 1, 1], [], []>} : vector<2x6xf32>, vector<6x8xf32>, vector<2x8xf32> -> vector<2x8xf32>
    %c0_3 = arith.constant 0 : index
    %c0_4 = arith.constant 0 : index
    %3 = vector.load %arg3[%c0_3, %c0_4] : memref<1x8xf32, #tpu.memory_space<vmem>>, vector<1x8xf32>
    %4 = vector.broadcast %3 : vector<1x8xf32> to vector<2x8xf32>
    %5 = arith.addf %2, %4 : vector<2x8xf32>
    %cst_5 = arith.constant 1.250000e-01 : f32
    %6 = vector.broadcast %cst_5 : f32 to vector<2x8xf32>
    %7 = arith.mulf %5, %6 : vector<2x8xf32>
    %cst_6 = arith.constant dense<0.000000e+00> : vector<2x2xf32>
    %8 = tpu.matmul %7, %5, %cst_6 {dimension_numbers = #tpu.dot_dimension_numbers<[1], [1], [0], [0], [0, 0, 1, 0], [], []>} : vector<2x8xf32>, vector<2x8xf32>, vector<2x2xf32> -> vector<2x2xf32>
    %cst_7 = arith.constant dense<0xFF800000> : vector<2xf32>
    %9 = vector.multi_reduction <maximumf>, %8, %cst_7 [1] : vector<2x2xf32> to vector<2xf32>
    %10 = vector.shape_cast %9 : vector<2xf32> to vector<2x1xf32>
    %11 = vector.broadcast %10 : vector<2x1xf32> to vector<2x2xf32>
    %12 = arith.subf %8, %11 : vector<2x2xf32>
    %13 = math.exp %12 : vector<2x2xf32>
    %cst_8 = arith.constant dense<0.000000e+00> : vector<2xf32>
    %14 = vector.multi_reduction <add>, %13, %cst_8 [1] : vector<2x2xf32> to vector<2xf32>
    %15 = vector.shape_cast %14 : vector<2xf32> to vector<2x1xf32>
    %16 = tpu.reciprocal %15 {approx = true} : vector<2x1xf32> -> vector<2x1xf32>
    %cst_9 = arith.constant 1.66666651 : f32
    %17 = vector.broadcast %cst_9 : f32 to vector<2x1xf32>
    %18 = arith.mulf %16, %17 : vector<2x1xf32>
    %19 = vector.broadcast %18 : vector<2x1xf32> to vector<2x2xf32>
    %20 = arith.mulf %13, %19 : vector<2x2xf32>
    %c0_10 = arith.constant 0 : index
    %21 = memref.load %arg0[%c0_10] : memref<1xi32, #tpu.memory_space<smem>>
    %22 = tpu.iota {dimensions = array<i32: 0>} : vector<2x2xi32>
    %23 = tpu.iota {dimensions = array<i32: 1>} : vector<2x2xi32>
    %c-1640531527_i32 = arith.constant -1640531527 : i32
    %24 = arith.xori %21, %c-1640531527_i32 : i32
    %25 = vector.broadcast %24 : i32 to vector<2x2xi32>
    %26 = arith.xori %25, %22 : vector<2x2xi32>
    %c16_i32 = arith.constant 16 : i32
    %27 = vector.broadcast %c16_i32 : i32 to vector<2x2xi32>
    %28 = arith.shrui %26, %27 : vector<2x2xi32>
    %29 = arith.xori %26, %28 : vector<2x2xi32>
    %c-2048144789_i32 = arith.constant -2048144789 : i32
    %30 = vector.broadcast %c-2048144789_i32 : i32 to vector<2x2xi32>
    %31 = arith.muli %29, %30 : vector<2x2xi32>
    %c13_i32 = arith.constant 13 : i32
    %32 = vector.broadcast %c13_i32 : i32 to vector<2x2xi32>
    %33 = arith.shrui %31, %32 : vector<2x2xi32>
    %34 = arith.xori %31, %33 : vector<2x2xi32>
    %c-1028477387_i32 = arith.constant -1028477387 : i32
    %35 = vector.broadcast %c-1028477387_i32 : i32 to vector<2x2xi32>
    %36 = arith.muli %34, %35 : vector<2x2xi32>
    %c16_i32_11 = arith.constant 16 : i32
    %37 = vector.broadcast %c16_i32_11 : i32 to vector<2x2xi32>
    %38 = arith.shrui %36, %37 : vector<2x2xi32>
    %39 = arith.xori %36, %38 : vector<2x2xi32>
    %40 = arith.xori %39, %23 : vector<2x2xi32>
    %c16_i32_12 = arith.constant 16 : i32
    %41 = vector.broadcast %c16_i32_12 : i32 to vector<2x2xi32>
    %42 = arith.shrui %40, %41 : vector<2x2xi32>
    %43 = arith.xori %40, %42 : vector<2x2xi32>
    %c-2048144789_i32_13 = arith.constant -2048144789 : i32
    %44 = vector.broadcast %c-2048144789_i32_13 : i32 to vector<2x2xi32>
    %45 = arith.muli %43, %44 : vector<2x2xi32>
    %c13_i32_14 = arith.constant 13 : i32
    %46 = vector.broadcast %c13_i32_14 : i32 to vector<2x2xi32>
    %47 = arith.shrui %45, %46 : vector<2x2xi32>
    %48 = arith.xori %45, %47 : vector<2x2xi32>
    %c-1028477387_i32_15 = arith.constant -1028477387 : i32
    %49 = vector.broadcast %c-1028477387_i32_15 : i32 to vector<2x2xi32>
    %50 = arith.muli %48, %49 : vector<2x2xi32>
    %c16_i32_16 = arith.constant 16 : i32
    %51 = vector.broadcast %c16_i32_16 : i32 to vector<2x2xi32>
    %52 = arith.shrui %50, %51 : vector<2x2xi32>
    %53 = arith.xori %50, %52 : vector<2x2xi32>
    %c1717986703_i32 = arith.constant 1717986703 : i32
    %54 = vector.broadcast %c1717986703_i32 : i32 to vector<2x2xi32>
    %55 = arith.cmpi uge, %53, %54 : vector<2x2xi32>
    %cst_17 = arith.constant 0.000000e+00 : f32
    %56 = vector.broadcast %cst_17 : f32 to vector<2x2xf32>
    %57 = arith.select %55, %20, %56 : vector<2x2xi1>, vector<2x2xf32>
    %cst_18 = arith.constant dense<0.000000e+00> : vector<2x8xf32>
    %58 = tpu.matmul %57, %5, %cst_18 {dimension_numbers = #tpu.dot_dimension_numbers<[1], [0], [0], [1], [0, 0, 1, 1], [], []>} : vector<2x2xf32>, vector<2x8xf32>, vector<2x8xf32> -> vector<2x8xf32>
    %c0_19 = arith.constant 0 : index
    %c0_20 = arith.constant 0 : index
    %59 = vector.load %arg4[%c0_19, %c0_20] : memref<2x8xf32, #tpu.memory_space<vmem>>, vector<2x8xf32>
    tpu.vector_store %arg4[%c0_19, %c0_20], %58 {strides = array<i32>} : memref<2x8xf32, #tpu.memory_space<vmem>>, vector<2x8xf32>,
    return
  }
}

</mosaic_0001>

<bundles_post_ra>
// kernel: tpu_custom_call.1
= control target key start
LH: loop header
LB: loop body
LE: loop exit
PB: predicated region body
PF: predicated region fallthrough
CT: control target
= control target key end

     0   :  { %10 = vsyncpa [#allocation4], 0  ;;  %s476_s0 = inlined_call_operand.<no memory space> [shape: s32[1], index: 0, kind: input, shape index: {}]   ;;  %s477_s1 = inlined_call_operand.vmem [shape: f32[2,6], index: 1, kind: input, shape index: {}]   ;;  %s478_s2 = inlined_call_operand.hbm [shape: f32[6,8], index: 2, kind: input, shape index: {}]   ;;  %s479_s3 = inlined_call_operand.vmem [shape: f32[1,8], index: 3, kind: input, shape index: {}]   ;;  %s480_s4 = inlined_call_operand.hbm [shape: f32[2,8], index: 4, kind: output, shape index: {}]  }
   0x1   :  { %11 = vsyncpa [#allocation5], 0  ;;  %s414_s15 = smov [#allocation3]   ;;  %s366_s19 = scalar_lea.hbm %s478_s2, 128 }
   0x2   :  { %s22_s16 = sshll.u32 %s414_s15, 4  ;;  %p367_p0 = scmp.ne.s32.totalorder %s478_s2, %s366_s19  ;;  %s23_s16 = int_to_ptr.vmem [resolvable:$true] %s22_s16 }
   0x3   :  { %p370_p1 = scmp.lt.u32.totalorder %s366_s19, %s478_s2 }
   0x5   :  { %p372_p2 = pnand %p370_p1, %p367_p0 }
   0x7   :  { %375 = shalt.err (!%p372_p2)
}
   0x8   :  { %s376_s24 = scalar_lea.vmem %s23_s16, 128  ;;  %p381_p4 = scmp.lt.s32.totalorder %s23_s16, %s23_s16 }
   0x9   :  { %p377_p3 = scmp.ne.s32.totalorder %s23_s16, %s376_s24  ;;  %p382_p5 = scmp.lt.s32.totalorder %s376_s24, %s376_s24 }
   0xb   :  { %p383_p6 = por %p382_p5, %p381_p4 }
   0xd   :  { %p384_p7 = pnand %p383_p6, %p377_p3 }
   0xf   :  { %387 = shalt.err (!%p384_p7)
}
  0x10   :  { %25 = dma.hbm_to_vmem [thread:$0]  %s478_s2, 128, %s23_s16, [#allocation4]  }
  0x11   :  { %410 = dma.done.wait [#allocation4], 128  }
  0x12   :  { %411 = vsyncadd [#allocation4], 4294967168  ;;  %v415_v0 = vmov 0.0   ;;  %vm416_vm0 = vmmov 0   ;;  %vm44_vm1 = vcmask 1045504   ;;  %vm40_vm2 = vcmask 48128  }
  0x13   :  { %343 = vmatprep.subr.mxu0 %v415_v0  ;;  %345 = vmatprep.mubr.msk.f32.mxu0 %vm416_vm0, %v415_v0  ;;  %v32_v1 = vld [vmem:[#allocation3] sm:$0x3f]  ;;  %vm119_vm3 = vcmask 64512   ;;  %vm240_vm4 = vcmask 1041408   ;;  %vm196_vm5 = vcmask 9216   ;;  %v210_v16 = vlaneseq }
  0x14   :  { %348 = vmatprep.subr.mxu1 %v415_v0  ;;  %350 = vmatprep.mubr.msk.f32.mxu1 %vm416_vm0, %v415_v0  ;;  %v31_v2 = vld [vmem:[%s477_s1] sm:$0x3]  ;;  %s214_s30 = sxor.u32 2654435769, %s476_s0  ;;  %vm236_vm7 = vcmask 15360   ;;  %s417_s0 = smov [#allocation6]  }
  0x15   :  { %344 = vmatpush3.msk.msra.mxu0 %vm44_vm1, %v32_v1  ;;  %v330_v3 = vld [vmem:[%s479_s3] ss:$0 sm:$0xff]  ;;  %v211_v17 = vshrl.u32 %v210_v16, 7  ;;  %v215_v18 = vstv %s214_s30  ;;  %v213_v27 = vand.u32 127, %v210_v16  ;;  %s321_s5 = sshll.u32 %s417_s0, 4  ;;  %vm313_vm8 = vcmask 58368   ;;  %s322_s5 = int_to_ptr.vmem [resolvable:$true] %s321_s5 }
  0x16   :  { %346 = vmatmul.mubr.msk.f32.vlgmr.msra.gmra.mrb[0].mxu0 %vm40_vm2, %v31_v2  ;;  %353 = vmatprep.subr.mxu0 %v415_v0  ;;  %s388_s6 = scalar_lea.vmem %s322_s5, 32  ;;  %p393_p9 = scmp.lt.s32.totalorder %s322_s5, %s322_s5 }
  0x17   :  { %355 = vmatprep.mubr.msk.f32.mxu0 %vm416_vm0, %v415_v0  ;;  %v216_v19 = vxor.u32 %v215_v18, %v211_v17  ;;  %p389_p8 = scmp.ne.s32.totalorder %s322_s5, %s388_s6  ;;  %p394_p10 = scmp.lt.s32.totalorder %s388_s6, %s388_s6 }
  0x19   :  { %v217_v20 = vshrl.u32 %v216_v19, 16  ;;  %p395_p11 = por %p394_p10, %p393_p9 }
  0x1b   :  { %v218_v21 = vxor.u32 %v217_v20, %v216_v19  ;;  %p396_p12 = pnand %p395_p11, %p389_p8 }
  0x1d   :  { %v219_v22 = vmul.u32 2246822507, %v218_v21 }
  0x1f   :  { %v220_v23 = vshrl.u32 %v219_v22, 13 }
  0x21   :  { %v221_v24 = vxor.u32 %v220_v23, %v219_v22 }
  0x23   :  { %v222_v25 = vmul.u32 3266489909, %v221_v24 }
  0x25   :  { %v223_v26 = vshrl.u32 %v222_v25, 16 }
  0x27   :  { %v224_v28 = vxor.u32 %v223_v26, %v222_v25 }
  0x29   :  { %v225_v29 = vxor.u32 %v224_v28, %v213_v27 }
  0x2b   :  { %v226_v30 = vshrl.u32 %v225_v29, 16 }
  0x2d   :  { %v227_v31 = vxor.u32 %v226_v30, %v225_v29 }
  0x2f   :  { %v228_v32 = vmul.u32 2246822507, %v227_v31 }
  0x31   :  { %v229_v33 = vshrl.u32 %v228_v32, 13 }
  0x33   :  { %v230_v34 = vxor.u32 %v229_v33, %v228_v32 }
  0x35   :  { %v231_v36 = vmul.u32 3266489909, %v230_v34 }
  0x37   :  { %v232_v37 = vshrl.u32 %v231_v36, 16 }
  0x39   :  { %v233_v38 = vxor.u32 %v232_v37, %v231_v36 }
  0x3b   :  { %vm234_vm6 = vcmp.ge.u32.totalorder %v233_v38, 1717986703 }
  0xe9   :  { %v114_v4 = vpop.f32.mrb[0].mxu0 }
  0xea   :  { %v115_v5 = vadd.f32 %v330_v3, %v114_v4  ;;  %v347_v6 = vpop.f32.mrb[1].mxu0 }
  0xec   :  { %v118_v7 = vmul.f32 0.125, %v115_v5  ;;  %349 = vmatpush3.xpose.msk.msra.mxu1 %vm119_vm3, %v115_v5  ;;  %354 = vmatpush3.msk.msra.mxu0 %vm240_vm4, %v115_v5 }
  0xef   :  { %351 = vmatmul.mubr.msk.f32.vlgmr.msra.gmra.mrb[0].mxu1 %vm119_vm3, %v118_v7 }
 0x1c2   :  { %v192_v8 = vpop.f32.mrb[0].mxu1 }
 0x1c3   :  { %v352_v9 = vpop.f32.mrb[1].mxu1  ;;  %v197_v10 = vsel %vm196_vm5, %v192_v8, -inf }
 0x1c4   :  { %198 = vmax.xlane.f32.xlu0 %v197_v10 }
 0x251   :  { %v199_v11 = vpop.xlane.xlu0 %198 }
 0x252   :  { %v200_v12 = vsub.f32 %v192_v8, %v199_v11 }
 0x254   :  { %v201_v13 = vmul.f32 1.442695, %v200_v12 }
 0x256   :  { %362 = vpow2.f32 %v201_v13 }
 0x260   :  { %v363_v14 = vpop.eup %362 }
 0x261   :  { %v203_v15 = vsel %vm196_vm5, %v363_v14, 0.0 }
 0x262   :  { %204 = vadd.xlane.f32.xlu0 %v203_v15 }
 0x2ef   :  { %v205_v35 = vpop.xlane.xlu0 %204 }
 0x2f0   :  { %364 = vrcp.f32 %v205_v35 }
 0x2fa   :  { %v365_v39 = vpop.eup %364 }
 0x2fb   :  { %v207_v40 = vmul.f32 1.6666665, %v365_v39 }
 0x2fd   :  { %v208_v41 = vmul.f32 %v363_v14, %v207_v40 }
 0x2ff   :  { %v235_v42 = vsel %vm234_vm6, %v208_v41, 0.0 }
 0x300   :  { %356 = vmatmul.mubr.msk.f32.vlgmr.msra.gmra.mrb[2].mxu0 %vm236_vm7, %v235_v42 }
 0x3d3   :  { %v309_v43 = vpop.f32.mrb[2].mxu0 }
 0x3d4   :  { %v357_v44 = vpop.f32.mrb[3].mxu0  ;;  %314 = vst.msk [vmem:[#allocation6] sm:$0x3] %vm313_vm8, %v309_v43 }
 0x3d5   :  { %399 = shalt.err (!%p396_p12)
}
 0x3d6   :  { %s400_s9 = scalar_lea.hbm %s480_s4, 32 }
 0x3d7   :  { %p401_p13 = scmp.ne.s32.totalorder %s480_s4, %s400_s9  ;;  %p404_p0 = scmp.lt.u32.totalorder %s400_s9, %s480_s4 }
 0x3d9   :  { %p406_p1 = pnand %p404_p0, %p401_p13 }
 0x3db   :  { %409 = shalt.err (!%p406_p1)
}
 0x3dc   :  { %324 = dma.vmem_to_hbm [thread:$0]  %s322_s5, 32, %s480_s4, [#allocation5]  }
 0x3dd   :  { %412 = dma.done.wait [#allocation5], 32  }
 0x3de   :  { %413 = vsyncadd [#allocation5], 4294967264 }
 0x3df   :  { %328 = vsyncpa [#allocation4], 1 }
 0x3e0   :  { %329 = vsyncpa [#allocation5], 1 }

</bundles_post_ra>
